<compile_context>
chip_gen: v6e
topology: v6e:2x2x1
jax: 0.10.0
libtpu: 0.0.40
codegen_flags: <defaults>
</compile_context>

<pallas_src>
import math

import jax
import jax.numpy as jnp
from jax import lax
from jax.experimental import pallas as pl
from jax.experimental.pallas import tpu as pltpu


def _make_attention_kernel(num_heads, head_dim, seq_len, tile_q, hidden,
                           ln_eps, compute_dtype):
    H = hidden
    S = seq_len

    def kernel(x_ref, mask_ref,
               wqkv_ref, bqkv_ref, wo_ref, bo_ref, gamma_ref, beta_ref,
               out_ref,
               q_scr, k_scr, v_scr, ctx_scr):
        qi = pl.program_id(1)

        # ---- fused QKV projection: once per batch element, cached in VMEM ----
        # (1/sqrt(head_dim) is already folded into the Q weights/bias.)
        @pl.when(qi == 0)
        def _():
            x_full = x_ref[0].astype(compute_dtype)                 # (S, H)
            qkv = jnp.dot(x_full, wqkv_ref[...],
                          preferred_element_type=jnp.float32) + bqkv_ref[...]
            q_scr[...] = qkv[:, 0 * H:1 * H].astype(compute_dtype)
            k_scr[...] = qkv[:, 1 * H:2 * H].astype(compute_dtype)
            v_scr[...] = qkv[:, 2 * H:3 * H].astype(compute_dtype)

        q_start = pl.multiple_of(qi * tile_q, tile_q)
        x_tile = x_ref[0, pl.ds(q_start, tile_q), :]                # (tq, H) f32 residual
        # additive mask broadcast hoisted out of the per-head loop
        mask_b = jnp.broadcast_to(mask_ref[0], (tile_q, S)).astype(jnp.float32)

        # ---- per-head scaled dot-product attention ----
        for h in range(num_heads):
            sl = slice(h * head_dim, (h + 1) * head_dim)
            qh = q_scr[pl.ds(q_start, tile_q), sl]                  # (tq, dh)
            kh = k_scr[:, sl]                                       # (S, dh)
            vh = v_scr[:, sl]                                       # (S, dh)

            # q @ k^T without materializing a transpose of kh
            scores = lax.dot_general(
                qh, kh,
                dimension_numbers=(((1,), (1,)), ((), ())),
                preferred_element_type=jnp.float32)
            scores = scores + mask_b

            # numerically-stable softmax; normalization deferred to after P@V
            scores = scores - jnp.max(scores, axis=-1, keepdims=True)
            p = jnp.exp(scores)                                     # (tq, S) unnormalized
            denom = jnp.sum(p, axis=-1, keepdims=True)              # (tq, 1)
            r = pl.reciprocal(denom, approx=True)                   # EUP slot
            r = r * (2.0 - denom * r)                               # one Newton step

            ctx = jnp.dot(p.astype(compute_dtype), vh,
                          preferred_element_type=jnp.float32)       # (tq, dh)
            ctx_scr[:, sl] = ctx * r                                # normalize small tensor

        # ---- output dense + residual + LayerNorm ----
        ctx_all = ctx_scr[...].astype(compute_dtype)                # (tq, H)
        dense = jnp.dot(ctx_all, wo_ref[...],
                        preferred_element_type=jnp.float32) + bo_ref[...]
        h2 = dense + x_tile
        mean = jnp.mean(h2, axis=-1, keepdims=True)
        var = jnp.mean((h2 - mean) ** 2, axis=-1, keepdims=True)
        normed = (h2 - mean) * lax.rsqrt(var + ln_eps)
        out_ref[0] = (normed * gamma_ref[...] + beta_ref[...]).astype(out_ref.dtype)

    return kernel


def visual_bert_attention(hidden_states, attention_mask, params, *,
                          num_heads, ln_eps=1e-12,
                          compute_dtype=jnp.float32, tile_q=None):
    """hidden_states: [B,S,H] f32; attention_mask: [B,1,S] additive f32 (or None)."""
    B, S, H = hidden_states.shape
    assert H % num_heads == 0
    head_dim = H // num_heads
    scale = 1.0 / math.sqrt(head_dim)

    if attention_mask is None:
        attention_mask = jnp.zeros((B, 1, S), jnp.float32)

    if tile_q is None:
        tile_q = S
        for cand in (512, 256, 128):
            if S % cand == 0:
                tile_q = cand
                break
    assert S % tile_q == 0
    num_q_tiles = S // tile_q

    # Pre-fuse / pre-transpose weights:  y = x @ W^T + b  ->  y = x @ W_t + b
    # Attention scale folded into the query projection.
    wqkv = jnp.concatenate(
        [params["wq"].T * scale, params["wk"].T, params["wv"].T], axis=1
    ).astype(compute_dtype)                                         # (H, 3H)
    bqkv = jnp.concatenate(
        [params["bq"] * scale, params["bk"], params["bv"]], axis=1
    ).astype(jnp.float32)                                           # (1, 3H)
    wo_t = params["wo"].T.astype(compute_dtype)                     # (H, H)
    bo = params["bo"].astype(jnp.float32)
    gamma = params["gamma"].astype(jnp.float32)
    beta = params["beta"].astype(jnp.float32)

    kernel = _make_attention_kernel(num_heads, head_dim, S, tile_q, H,
                                    ln_eps, compute_dtype)

    def rep(shape):
        return pl.BlockSpec(shape, lambda b, q, _n=len(shape): (0,) * _n)

    return pl.pallas_call(
        kernel,
        out_shape=jax.ShapeDtypeStruct((B, S, H), hidden_states.dtype),
        grid_spec=pltpu.PrefetchScalarGridSpec(
            num_scalar_prefetch=0,
            grid=(B, num_q_tiles),
            in_specs=[
                pl.BlockSpec((1, S, H), lambda b, q: (b, 0, 0)),    # hidden_states
                pl.BlockSpec((1, 1, S), lambda b, q: (b, 0, 0)),    # additive mask
                rep((H, 3 * H)), rep((1, 3 * H)),                   # fused QKV W / b
                rep((H, H)), rep((1, H)),                           # output dense W / b
                rep((1, H)), rep((1, H)),                           # LN gamma / beta
            ],
            out_specs=pl.BlockSpec((1, tile_q, H), lambda b, q: (b, q, 0)),
            scratch_shapes=[
                pltpu.VMEM((S, H), compute_dtype),                  # Q cache
                pltpu.VMEM((S, H), compute_dtype),                  # K cache
                pltpu.VMEM((S, H), compute_dtype),                  # V cache
                pltpu.VMEM((tile_q, H), jnp.float32),               # context slab
            ]),
        compiler_params=pltpu.CompilerParams(
            dimension_semantics=("parallel", "arbitrary"),
            vmem_limit_bytes=64 * 1024 * 1024),
    )(hidden_states, attention_mask, wqkv, bqkv, wo_t, bo, gamma, beta)


def _reference(hidden_states, attention_mask, params, *, num_heads, ln_eps=1e-12):
    """Pure-JAX reference mirroring the PyTorch forward (eval mode)."""
    B, S, H = hidden_states.shape
    dh = H // num_heads

    def lin(x, w, b):
        return x @ w.T + b[0]

    q = lin(hidden_states, params["wq"], params["bq"])
    k = lin(hidden_states, params["wk"], params["bk"])
    v = lin(hidden_states, params["wv"], params["bv"])

    def split(x):  # (B,S,H) -> (B,heads,S,dh)
        return x.reshape(B, S, num_heads, dh).transpose(0, 2, 1, 3)

    q, k, v = split(q), split(k), split(v)
    scores = jnp.einsum("bhqd,bhkd->bhqk", q, k) / math.sqrt(dh)
    scores = scores + attention_mask[:, None, :, :]
    probs = jax.nn.softmax(scores, axis=-1)
    ctx = jnp.einsum("bhqk,bhkd->bhqd", probs, v)
    ctx = ctx.transpose(0, 2, 1, 3).reshape(B, S, H)

    dense = lin(ctx, params["wo"], params["bo"])
    h2 = dense + hidden_states
    mean = jnp.mean(h2, axis=-1, keepdims=True)
    var = jnp.mean((h2 - mean) ** 2, axis=-1, keepdims=True)
    normed = (h2 - mean) / jnp.sqrt(var + ln_eps)
    return normed * params["gamma"][0] + params["beta"][0]


def _make_params(key, H):
    ks = jax.random.split(key, 8)

    def w_init(k, shape, fan_in):
        bound = 1.0 / math.sqrt(fan_in)
        return jax.random.uniform(k, shape, jnp.float32, -bound, bound)

    return {
        "wq": w_init(ks[0], (H, H), H), "bq": w_init(ks[1], (1, H), H),
        "wk": w_init(ks[2], (H, H), H), "bk": w_init(ks[3], (1, H), H),
        "wv": w_init(ks[4], (H, H), H), "bv": w_init(ks[5], (1, H), H),
        "wo": w_init(ks[6], (H, H), H), "bo": w_init(ks[7], (1, H), H),
        "gamma": jnp.ones((1, H), jnp.float32),
        "beta": jnp.zeros((1, H), jnp.float32),
    }


if __name__ == "__main__":
    root = jax.random.PRNGKey(0)
    k1, k2, k3, k4 = jax.random.split(root, 4)

    # ---- test 1: small config (B=2, S=8, H=32, heads=4), f32 compute ----
    B, S, H, NH = 2, 8, 32, 4
    params = _make_params(k1, H)
    hidden_states = jax.random.normal(k2, (B, S, H), jnp.float32)
    mask = jnp.zeros((B, 1, S), jnp.float32)
    mask = mask.at[1, 0, -2:].set(-10000.0)   # mask last 2 keys of batch 1

    out = visual_bert_attention(hidden_states, mask, params,
                                num_heads=NH, compute_dtype=jnp.float32)
    out = jax.block_until_ready(out)
    ref = _reference(hidden_states, mask, params, num_heads=NH)
    assert out.shape == (B, S, H)
    assert jnp.allclose(out, ref, atol=1e-4, rtol=1e-4), \
        f"f32 max abs err {jnp.max(jnp.abs(out - ref))}"

    # ---- test 2: tiled query axis (B=1, S=256, H=128, heads=2), bf16 MXU ----
    B2, S2, H2, NH2 = 1, 256, 128, 2
    params2 = _make_params(k3, H2)
    hidden2 = jax.random.normal(k4, (B2, S2, H2), jnp.float32)
    mask2 = jnp.zeros((B2, 1, S2), jnp.float32)
    mask2 = mask2.at[0, 0, 192:].set(-10000.0)

    out2 = visual_bert_attention(hidden2, mask2, params2, num_heads=NH2,
                                 compute_dtype=jnp.bfloat16, tile_q=128)
    out2 = jax.block_until_ready(out2)
    ref2 = _reference(hidden2, mask2, params2, num_heads=NH2)
    assert out2.shape == (B2, S2, H2)
    assert jnp.allclose(out2, ref2, atol=5e-2, rtol=5e-2), \
        f"bf16 max abs err {jnp.max(jnp.abs(out2 - ref2))}"

    print("KERNEL_OK")
</pallas_src>

<mosaic_0001>
module attributes {stable_mosaic.version = 11 : i64} {
  func.func @kernel(%arg0: i32, %arg1: i32, %arg2: memref<1x8x32xf32, #tpu.memory_space<vmem>>, %arg3: memref<1x1x8xf32, #tpu.memory_space<vmem>>, %arg4: memref<32x96xf32, #tpu.memory_space<vmem>>, %arg5: memref<1x96xf32, #tpu.memory_space<vmem>>, %arg6: memref<32x32xf32, #tpu.memory_space<vmem>>, %arg7: memref<1x32xf32, #tpu.memory_space<vmem>>, %arg8: memref<1x32xf32, #tpu.memory_space<vmem>>, %arg9: memref<1x32xf32, #tpu.memory_space<vmem>>, %arg10: memref<1x8x32xf32, #tpu.memory_space<vmem>>, %arg11: memref<8x32xf32, #tpu.memory_space<vmem>>, %arg12: memref<8x32xf32, #tpu.memory_space<vmem>>, %arg13: memref<8x32xf32, #tpu.memory_space<vmem>>, %arg14: memref<8x32xf32, #tpu.memory_space<vmem>>) attributes {dimension_semantics = [#tpu.dimension_semantics<parallel>, #tpu.dimension_semantics<arbitrary>], iteration_bounds = array<i64: 2, 1>, scalar_prefetch = 0 : i64, scratch_operands = 4 : i64, tpu.core_type = #tpu.core_type<tc>, window_params = [{transform_indices = @transform_0, window_bounds = array<i64: 1, 8, 32>}, {transform_indices = @transform_1, window_bounds = array<i64: 1, 1, 8>}, {pipeline_mode = #tpu.pipeline_mode<synchronous>, transform_indices = @transform_2, window_bounds = array<i64: 32, 96>}, {pipeline_mode = #tpu.pipeline_mode<synchronous>, transform_indices = @transform_3, window_bounds = array<i64: 1, 96>}, {pipeline_mode = #tpu.pipeline_mode<synchronous>, transform_indices = @transform_4, window_bounds = array<i64: 32, 32>}, {pipeline_mode = #tpu.pipeline_mode<synchronous>, transform_indices = @transform_5, window_bounds = array<i64: 1, 32>}, {pipeline_mode = #tpu.pipeline_mode<synchronous>, transform_indices = @transform_6, window_bounds = array<i64: 1, 32>}, {pipeline_mode = #tpu.pipeline_mode<synchronous>, transform_indices = @transform_7, window_bounds = array<i64: 1, 32>}, {transform_indices = @transform_8, window_bounds = array<i64: 1, 8, 32>}]} {
    %c0_i32 = arith.constant 0 : i32
    %0 = arith.cmpi eq, %arg1, %c0_i32 : i32
    %1 = arith.extui %0 : i1 to i32
    %c0_i32_0 = arith.constant 0 : i32
    %2 = arith.cmpi ne, %1, %c0_i32_0 : i32
    scf.if %2 {
      %c0_68 = arith.constant 0 : index
      %c0_69 = arith.constant 0 : index
      %c0_70 = arith.constant 0 : index
      %134 = vector.load %arg2[%c0_68, %c0_69, %c0_70] : memref<1x8x32xf32, #tpu.memory_space<vmem>>, vector<1x8x32xf32>
      %135 = vector.shape_cast %134 : vector<1x8x32xf32> to vector<8x32xf32>
      %c0_71 = arith.constant 0 : index
      %c0_72 = arith.constant 0 : index
      %136 = vector.load %arg4[%c0_71, %c0_72] : memref<32x96xf32, #tpu.memory_space<vmem>>, vector<32x96xf32>
      %cst_73 = arith.constant dense<0.000000e+00> : vector<8x96xf32>
      %137 = tpu.matmul %135, %136, %cst_73 {dimension_numbers = #tpu.dot_dimension_numbers<[1], [0], [0], [1], [0, 0, 1, 1], [], []>} : vector<8x32xf32>, vector<32x96xf32>, vector<8x96xf32> -> vector<8x96xf32>
      %c0_74 = arith.constant 0 : index
      %c0_75 = arith.constant 0 : index
      %138 = vector.load %arg5[%c0_74, %c0_75] : memref<1x96xf32, #tpu.memory_space<vmem>>, vector<1x96xf32>
      %139 = vector.broadcast %138 : vector<1x96xf32> to vector<8x96xf32>
      %140 = arith.addf %137, %139 : vector<8x96xf32>
      %141 = vector.extract_strided_slice %140 {offsets = [0, 0], sizes = [8, 32], strides = [1, 1]} : vector<8x96xf32> to vector<8x32xf32>
      %c0_76 = arith.constant 0 : index
      %c0_77 = arith.constant 0 : index
      %142 = vector.load %arg11[%c0_76, %c0_77] : memref<8x32xf32, #tpu.memory_space<vmem>>, vector<8x32xf32>
      tpu.vector_store %arg11[%c0_76, %c0_77], %141 {strides = array<i32>} : memref<8x32xf32, #tpu.memory_space<vmem>>, vector<8x32xf32>,
      %143 = vector.extract_strided_slice %140 {offsets = [0, 32], sizes = [8, 32], strides = [1, 1]} : vector<8x96xf32> to vector<8x32xf32>
      %c0_78 = arith.constant 0 : index
      %c0_79 = arith.constant 0 : index
      %144 = vector.load %arg12[%c0_78, %c0_79] : memref<8x32xf32, #tpu.memory_space<vmem>>, vector<8x32xf32>
      tpu.vector_store %arg12[%c0_78, %c0_79], %143 {strides = array<i32>} : memref<8x32xf32, #tpu.memory_space<vmem>>, vector<8x32xf32>,
      %145 = vector.extract_strided_slice %140 {offsets = [0, 64], sizes = [8, 32], strides = [1, 1]} : vector<8x96xf32> to vector<8x32xf32>
      %c0_80 = arith.constant 0 : index
      %c0_81 = arith.constant 0 : index
      %146 = vector.load %arg13[%c0_80, %c0_81] : memref<8x32xf32, #tpu.memory_space<vmem>>, vector<8x32xf32>
      tpu.vector_store %arg13[%c0_80, %c0_81], %145 {strides = array<i32>} : memref<8x32xf32, #tpu.memory_space<vmem>>, vector<8x32xf32>,
    } else {
    }
    %c8_i32 = arith.constant 8 : i32
    %3 = arith.muli %arg1, %c8_i32 : i32
    %4 = tpu.assume_multiple %3, 8 : i32
    %c0 = arith.constant 0 : index
    %5 = arith.index_cast %4 : i32 to index
    %c0_1 = arith.constant 0 : index
    %6 = vector.load %arg2[%c0, %5, %c0_1] : memref<1x8x32xf32, #tpu.memory_space<vmem>>, vector<1x8x32xf32>
    %7 = vector.shape_cast %6 : vector<1x8x32xf32> to vector<8x32xf32>
    %c0_2 = arith.constant 0 : index
    %c0_3 = arith.constant 0 : index
    %c0_4 = arith.constant 0 : index
    %8 = vector.load %arg3[%c0_2, %c0_3, %c0_4] : memref<1x1x8xf32, #tpu.memory_space<vmem>>, vector<1x1x8xf32>
    %9 = vector.shape_cast %8 : vector<1x1x8xf32> to vector<1x8xf32>
    %10 = vector.shape_cast %9 : vector<1x8xf32> to vector<1x8xf32>
    %11 = vector.broadcast %10 : vector<1x8xf32> to vector<8x8xf32>
    %12 = arith.index_cast %4 : i32 to index
    %c0_5 = arith.constant 0 : index
    %13 = vector.load %arg11[%12, %c0_5] : memref<8x32xf32, #tpu.memory_space<vmem>>, vector<8x8xf32>
    %c0_6 = arith.constant 0 : index
    %c0_7 = arith.constant 0 : index
    %14 = vector.load %arg12[%c0_6, %c0_7] : memref<8x32xf32, #tpu.memory_space<vmem>>, vector<8x8xf32>
    %c0_8 = arith.constant 0 : index
    %c0_9 = arith.constant 0 : index
    %15 = vector.load %arg13[%c0_8, %c0_9] : memref<8x32xf32, #tpu.memory_space<vmem>>, vector<8x8xf32>
    %cst = arith.constant dense<0.000000e+00> : vector<8x8xf32>
    %16 = tpu.matmul %13, %14, %cst {dimension_numbers = #tpu.dot_dimension_numbers<[1], [1], [0], [0], [0, 0, 1, 0], [], []>} : vector<8x8xf32>, vector<8x8xf32>, vector<8x8xf32> -> vector<8x8xf32>
    %17 = arith.addf %16, %11 : vector<8x8xf32>
    %cst_10 = arith.constant dense<0xFF800000> : vector<8xf32>
    %18 = vector.multi_reduction <maximumf>, %17, %cst_10 [1] : vector<8x8xf32> to vector<8xf32>
    %19 = vector.shape_cast %18 : vector<8xf32> to vector<8x1xf32>
    %20 = vector.broadcast %19 : vector<8x1xf32> to vector<8x8xf32>
    %21 = arith.subf %17, %20 : vector<8x8xf32>
    %22 = math.exp %21 : vector<8x8xf32>
    %cst_11 = arith.constant dense<0.000000e+00> : vector<8xf32>
    %23 = vector.multi_reduction <add>, %22, %cst_11 [1] : vector<8x8xf32> to vector<8xf32>
    %24 = vector.shape_cast %23 : vector<8xf32> to vector<8x1xf32>
    %25 = tpu.reciprocal %24 {approx = true} : vector<8x1xf32> -> vector<8x1xf32>
    %26 = arith.mulf %24, %25 : vector<8x1xf32>
    %cst_12 = arith.constant 2.000000e+00 : f32
    %27 = vector.broadcast %cst_12 : f32 to vector<8x1xf32>
    %28 = arith.subf %27, %26 : vector<8x1xf32>
    %29 = arith.mulf %25, %28 : vector<8x1xf32>
    %cst_13 = arith.constant dense<0.000000e+00> : vector<8x8xf32>
    %30 = tpu.matmul %22, %15, %cst_13 {dimension_numbers = #tpu.dot_dimension_numbers<[1], [0], [0], [1], [0, 0, 1, 1], [], []>} : vector<8x8xf32>, vector<8x8xf32>, vector<8x8xf32> -> vector<8x8xf32>
    %31 = vector.broadcast %29 : vector<8x1xf32> to vector<8x8xf32>
    %32 = arith.mulf %30, %31 : vector<8x8xf32>
    %c0_14 = arith.constant 0 : index
    %c0_15 = arith.constant 0 : index
    %33 = vector.load %arg14[%c0_14, %c0_15] : memref<8x32xf32, #tpu.memory_space<vmem>>, vector<8x8xf32>
    tpu.vector_store %arg14[%c0_14, %c0_15], %32 {strides = array<i32>} : memref<8x32xf32, #tpu.memory_space<vmem>>, vector<8x8xf32>,
    %34 = arith.index_cast %4 : i32 to index
    %c8 = arith.constant 8 : index
    %35 = vector.load %arg11[%34, %c8] : memref<8x32xf32, #tpu.memory_space<vmem>>, vector<8x8xf32>
    %c0_16 = arith.constant 0 : index
    %c8_17 = arith.constant 8 : index
    %36 = vector.load %arg12[%c0_16, %c8_17] : memref<8x32xf32, #tpu.memory_space<vmem>>, vector<8x8xf32>
    %c0_18 = arith.constant 0 : index
    %c8_19 = arith.constant 8 : index
    %37 = vector.load %arg13[%c0_18, %c8_19] : memref<8x32xf32, #tpu.memory_space<vmem>>, vector<8x8xf32>
    %cst_20 = arith.constant dense<0.000000e+00> : vector<8x8xf32>
    %38 = tpu.matmul %35, %36, %cst_20 {dimension_numbers = #tpu.dot_dimension_numbers<[1], [1], [0], [0], [0, 0, 1, 0], [], []>} : vector<8x8xf32>, vector<8x8xf32>, vector<8x8xf32> -> vector<8x8xf32>
    %39 = arith.addf %38, %11 : vector<8x8xf32>
    %cst_21 = arith.constant dense<0xFF800000> : vector<8xf32>
    %40 = vector.multi_reduction <maximumf>, %39, %cst_21 [1] : vector<8x8xf32> to vector<8xf32>
    %41 = vector.shape_cast %40 : vector<8xf32> to vector<8x1xf32>
    %42 = vector.broadcast %41 : vector<8x1xf32> to vector<8x8xf32>
    %43 = arith.subf %39, %42 : vector<8x8xf32>
    %44 = math.exp %43 : vector<8x8xf32>
    %cst_22 = arith.constant dense<0.000000e+00> : vector<8xf32>
    %45 = vector.multi_reduction <add>, %44, %cst_22 [1] : vector<8x8xf32> to vector<8xf32>
    %46 = vector.shape_cast %45 : vector<8xf32> to vector<8x1xf32>
    %47 = tpu.reciprocal %46 {approx = true} : vector<8x1xf32> -> vector<8x1xf32>
    %48 = arith.mulf %46, %47 : vector<8x1xf32>
    %cst_23 = arith.constant 2.000000e+00 : f32
    %49 = vector.broadcast %cst_23 : f32 to vector<8x1xf32>
    %50 = arith.subf %49, %48 : vector<8x1xf32>
    %51 = arith.mulf %47, %50 : vector<8x1xf32>
    %cst_24 = arith.constant dense<0.000000e+00> : vector<8x8xf32>
    %52 = tpu.matmul %44, %37, %cst_24 {dimension_numbers = #tpu.dot_dimension_numbers<[1], [0], [0], [1], [0, 0, 1, 1], [], []>} : vector<8x8xf32>, vector<8x8xf32>, vector<8x8xf32> -> vector<8x8xf32>
    %53 = vector.broadcast %51 : vector<8x1xf32> to vector<8x8xf32>
    %54 = arith.mulf %52, %53 : vector<8x8xf32>
    %c0_25 = arith.constant 0 : index
    %c8_26 = arith.constant 8 : index
    %55 = vector.load %arg14[%c0_25, %c8_26] : memref<8x32xf32, #tpu.memory_space<vmem>>, vector<8x8xf32>
    tpu.vector_store %arg14[%c0_25, %c8_26], %54 {strides = array<i32>} : memref<8x32xf32, #tpu.memory_space<vmem>>, vector<8x8xf32>,
    %56 = arith.index_cast %4 : i32 to index
    %c16 = arith.constant 16 : index
    %57 = vector.load %arg11[%56, %c16] : memref<8x32xf32, #tpu.memory_space<vmem>>, vector<8x8xf32>
    %c0_27 = arith.constant 0 : index
    %c16_28 = arith.constant 16 : index
    %58 = vector.load %arg12[%c0_27, %c16_28] : memref<8x32xf32, #tpu.memory_space<vmem>>, vector<8x8xf32>
    %c0_29 = arith.constant 0 : index
    %c16_30 = arith.constant 16 : index
    %59 = vector.load %arg13[%c0_29, %c16_30] : memref<8x32xf32, #tpu.memory_space<vmem>>, vector<8x8xf32>
    %cst_31 = arith.constant dense<0.000000e+00> : vector<8x8xf32>
    %60 = tpu.matmul %57, %58, %cst_31 {dimension_numbers = #tpu.dot_dimension_numbers<[1], [1], [0], [0], [0, 0, 1, 0], [], []>} : vector<8x8xf32>, vector<8x8xf32>, vector<8x8xf32> -> vector<8x8xf32>
    %61 = arith.addf %60, %11 : vector<8x8xf32>
    %cst_32 = arith.constant dense<0xFF800000> : vector<8xf32>
    %62 = vector.multi_reduction <maximumf>, %61, %cst_32 [1] : vector<8x8xf32> to vector<8xf32>
    %63 = vector.shape_cast %62 : vector<8xf32> to vector<8x1xf32>
    %64 = vector.broadcast %63 : vector<8x1xf32> to vector<8x8xf32>
    %65 = arith.subf %61, %64 : vector<8x8xf32>
    %66 = math.exp %65 : vector<8x8xf32>
    %cst_33 = arith.constant dense<0.000000e+00> : vector<8xf32>
    %67 = vector.multi_reduction <add>, %66, %cst_33 [1] : vector<8x8xf32> to vector<8xf32>
    %68 = vector.shape_cast %67 : vector<8xf32> to vector<8x1xf32>
    %69 = tpu.reciprocal %68 {approx = true} : vector<8x1xf32> -> vector<8x1xf32>
    %70 = arith.mulf %68, %69 : vector<8x1xf32>
    %cst_34 = arith.constant 2.000000e+00 : f32
    %71 = vector.broadcast %cst_34 : f32 to vector<8x1xf32>
    %72 = arith.subf %71, %70 : vector<8x1xf32>
    %73 = arith.mulf %69, %72 : vector<8x1xf32>
    %cst_35 = arith.constant dense<0.000000e+00> : vector<8x8xf32>
    %74 = tpu.matmul %66, %59, %cst_35 {dimension_numbers = #tpu.dot_dimension_numbers<[1], [0], [0], [1], [0, 0, 1, 1], [], []>} : vector<8x8xf32>, vector<8x8xf32>, vector<8x8xf32> -> vector<8x8xf32>
    %75 = vector.broadcast %73 : vector<8x1xf32> to vector<8x8xf32>
    %76 = arith.mulf %74, %75 : vector<8x8xf32>
    %c0_36 = arith.constant 0 : index
    %c16_37 = arith.constant 16 : index
    %77 = vector.load %arg14[%c0_36, %c16_37] : memref<8x32xf32, #tpu.memory_space<vmem>>, vector<8x8xf32>
    tpu.vector_store %arg14[%c0_36, %c16_37], %76 {strides = array<i32>} : memref<8x32xf32, #tpu.memory_space<vmem>>, vector<8x8xf32>,
    %78 = arith.index_cast %4 : i32 to index
    %c24 = arith.constant 24 : index
    %79 = vector.load %arg11[%78, %c24] : memref<8x32xf32, #tpu.memory_space<vmem>>, vector<8x8xf32>
    %c0_38 = arith.constant 0 : index
    %c24_39 = arith.constant 24 : index
    %80 = vector.load %arg12[%c0_38, %c24_39] : memref<8x32xf32, #tpu.memory_space<vmem>>, vector<8x8xf32>
    %c0_40 = arith.constant 0 : index
    %c24_41 = arith.constant 24 : index
    %81 = vector.load %arg13[%c0_40, %c24_41] : memref<8x32xf32, #tpu.memory_space<vmem>>, vector<8x8xf32>
    %cst_42 = arith.constant dense<0.000000e+00> : vector<8x8xf32>
    %82 = tpu.matmul %79, %80, %cst_42 {dimension_numbers = #tpu.dot_dimension_numbers<[1], [1], [0], [0], [0, 0, 1, 0], [], []>} : vector<8x8xf32>, vector<8x8xf32>, vector<8x8xf32> -> vector<8x8xf32>
    %83 = arith.addf %82, %11 : vector<8x8xf32>
    %cst_43 = arith.constant dense<0xFF800000> : vector<8xf32>
    %84 = vector.multi_reduction <maximumf>, %83, %cst_43 [1] : vector<8x8xf32> to vector<8xf32>
    %85 = vector.shape_cast %84 : vector<8xf32> to vector<8x1xf32>
    %86 = vector.broadcast %85 : vector<8x1xf32> to vector<8x8xf32>
    %87 = arith.subf %83, %86 : vector<8x8xf32>
    %88 = math.exp %87 : vector<8x8xf32>
    %cst_44 = arith.constant dense<0.000000e+00> : vector<8xf32>
    %89 = vector.multi_reduction <add>, %88, %cst_44 [1] : vector<8x8xf32> to vector<8xf32>
    %90 = vector.shape_cast %89 : vector<8xf32> to vector<8x1xf32>
    %91 = tpu.reciprocal %90 {approx = true} : vector<8x1xf32> -> vector<8x1xf32>
    %92 = arith.mulf %90, %91 : vector<8x1xf32>
    %cst_45 = arith.constant 2.000000e+00 : f32
    %93 = vector.broadcast %cst_45 : f32 to vector<8x1xf32>
    %94 = arith.subf %93, %92 : vector<8x1xf32>
    %95 = arith.mulf %91, %94 : vector<8x1xf32>
    %cst_46 = arith.constant dense<0.000000e+00> : vector<8x8xf32>
    %96 = tpu.matmul %88, %81, %cst_46 {dimension_numbers = #tpu.dot_dimension_numbers<[1], [0], [0], [1], [0, 0, 1, 1], [], []>} : vector<8x8xf32>, vector<8x8xf32>, vector<8x8xf32> -> vector<8x8xf32>
    %97 = vector.broadcast %95 : vector<8x1xf32> to vector<8x8xf32>
    %98 = arith.mulf %96, %97 : vector<8x8xf32>
    %c0_47 = arith.constant 0 : index
    %c24_48 = arith.constant 24 : index
    %99 = vector.load %arg14[%c0_47, %c24_48] : memref<8x32xf32, #tpu.memory_space<vmem>>, vector<8x8xf32>
    tpu.vector_store %arg14[%c0_47, %c24_48], %98 {strides = array<i32>} : memref<8x32xf32, #tpu.memory_space<vmem>>, vector<8x8xf32>,
    %c0_49 = arith.constant 0 : index
    %c0_50 = arith.constant 0 : index
    %100 = vector.load %arg14[%c0_49, %c0_50] : memref<8x32xf32, #tpu.memory_space<vmem>>, vector<8x32xf32>
    %c0_51 = arith.constant 0 : index
    %c0_52 = arith.constant 0 : index
    %101 = vector.load %arg6[%c0_51, %c0_52] : memref<32x32xf32, #tpu.memory_space<vmem>>, vector<32x32xf32>
    %cst_53 = arith.constant dense<0.000000e+00> : vector<8x32xf32>
    %102 = tpu.matmul %100, %101, %cst_53 {dimension_numbers = #tpu.dot_dimension_numbers<[1], [0], [0], [1], [0, 0, 1, 1], [], []>} : vector<8x32xf32>, vector<32x32xf32>, vector<8x32xf32> -> vector<8x32xf32>
    %c0_54 = arith.constant 0 : index
    %c0_55 = arith.constant 0 : index
    %103 = vector.load %arg7[%c0_54, %c0_55] : memref<1x32xf32, #tpu.memory_space<vmem>>, vector<1x32xf32>
    %104 = vector.broadcast %103 : vector<1x32xf32> to vector<8x32xf32>
    %105 = arith.addf %102, %104 : vector<8x32xf32>
    %106 = arith.addf %105, %7 : vector<8x32xf32>
    %cst_56 = arith.constant dense<0.000000e+00> : vector<8xf32>
    %107 = vector.multi_reduction <add>, %106, %cst_56 [1] : vector<8x32xf32> to vector<8xf32>
    %108 = vector.shape_cast %107 : vector<8xf32> to vector<8x1xf32>
    %cst_57 = arith.constant 3.200000e+01 : f32
    %109 = vector.broadcast %cst_57 : f32 to vector<8x1xf32>
    %110 = arith.divf %108, %109 : vector<8x1xf32>
    %111 = vector.broadcast %110 : vector<8x1xf32> to vector<8x32xf32>
    %112 = arith.subf %106, %111 : vector<8x32xf32>
    %113 = arith.mulf %112, %112 : vector<8x32xf32>
    %cst_58 = arith.constant dense<0.000000e+00> : vector<8xf32>
    %114 = vector.multi_reduction <add>, %113, %cst_58 [1] : vector<8x32xf32> to vector<8xf32>
    %115 = vector.shape_cast %114 : vector<8xf32> to vector<8x1xf32>
    %cst_59 = arith.constant 3.200000e+01 : f32
    %116 = vector.broadcast %cst_59 : f32 to vector<8x1xf32>
    %117 = arith.divf %115, %116 : vector<8x1xf32>
    %118 = vector.broadcast %110 : vector<8x1xf32> to vector<8x32xf32>
    %119 = arith.subf %106, %118 : vector<8x32xf32>
    %cst_60 = arith.constant 9.99999996E-13 : f32
    %120 = vector.broadcast %cst_60 : f32 to vector<8x1xf32>
    %121 = arith.addf %117, %120 : vector<8x1xf32>
    %122 = math.rsqrt %121 : vector<8x1xf32>
    %123 = vector.broadcast %122 : vector<8x1xf32> to vector<8x32xf32>
    %124 = arith.mulf %119, %123 : vector<8x32xf32>
    %c0_61 = arith.constant 0 : index
    %c0_62 = arith.constant 0 : index
    %125 = vector.load %arg8[%c0_61, %c0_62] : memref<1x32xf32, #tpu.memory_space<vmem>>, vector<1x32xf32>
    %126 = vector.broadcast %125 : vector<1x32xf32> to vector<8x32xf32>
    %127 = arith.mulf %124, %126 : vector<8x32xf32>
    %c0_63 = arith.constant 0 : index
    %c0_64 = arith.constant 0 : index
    %128 = vector.load %arg9[%c0_63, %c0_64] : memref<1x32xf32, #tpu.memory_space<vmem>>, vector<1x32xf32>
    %129 = vector.broadcast %128 : vector<1x32xf32> to vector<8x32xf32>
    %130 = arith.addf %127, %129 : vector<8x32xf32>
    %c0_65 = arith.constant 0 : index
    %c0_66 = arith.constant 0 : index
    %c0_67 = arith.constant 0 : index
    %131 = vector.load %arg10[%c0_65, %c0_66, %c0_67] : memref<1x8x32xf32, #tpu.memory_space<vmem>>, vector<1x8x32xf32>
    %132 = vector.shape_cast %131 : vector<1x8x32xf32> to vector<8x32xf32>
    %133 = vector.shape_cast %130 : vector<8x32xf32> to vector<1x8x32xf32>
    tpu.vector_store %arg10[%c0_65, %c0_66, %c0_67], %133 {strides = array<i32>} : memref<1x8x32xf32, #tpu.memory_space<vmem>>, vector<1x8x32xf32>,
    return
  }
  func.func @transform_0(%arg0: i32, %arg1: i32) -> (i32, i32, i32) {
    %c0_i32 = arith.constant 0 : i32
    %c0_i32_0 = arith.constant 0 : i32
    %c0_i32_1 = arith.constant 0 : i32
    return %arg0, %c0_i32, %c0_i32_0 : i32, i32, i32
  }
  func.func @transform_1(%arg0: i32, %arg1: i32) -> (i32, i32, i32) {
    %c0_i32 = arith.constant 0 : i32
    %c0_i32_0 = arith.constant 0 : i32
    %c0_i32_1 = arith.constant 0 : i32
    return %arg0, %c0_i32, %c0_i32_0 : i32, i32, i32
  }
  func.func @transform_2(%arg0: i32, %arg1: i32) -> (i32, i32) {
    %c0_i32 = arith.constant 0 : i32
    %c0_i32_0 = arith.constant 0 : i32
    %c0_i32_1 = arith.constant 0 : i32
    return %c0_i32, %c0_i32_0 : i32, i32
  }
  func.func @transform_3(%arg0: i32, %arg1: i32) -> (i32, i32) {
    %c0_i32 = arith.constant 0 : i32
    %c0_i32_0 = arith.constant 0 : i32
    %c0_i32_1 = arith.constant 0 : i32
    return %c0_i32, %c0_i32_0 : i32, i32
  }
  func.func @transform_4(%arg0: i32, %arg1: i32) -> (i32, i32) {
    %c0_i32 = arith.constant 0 : i32
    %c0_i32_0 = arith.constant 0 : i32
    %c0_i32_1 = arith.constant 0 : i32
    return %c0_i32, %c0_i32_0 : i32, i32
  }
  func.func @transform_5(%arg0: i32, %arg1: i32) -> (i32, i32) {
    %c0_i32 = arith.constant 0 : i32
    %c0_i32_0 = arith.constant 0 : i32
    %c0_i32_1 = arith.constant 0 : i32
    return %c0_i32, %c0_i32_0 : i32, i32
  }
  func.func @transform_6(%arg0: i32, %arg1: i32) -> (i32, i32) {
    %c0_i32 = arith.constant 0 : i32
    %c0_i32_0 = arith.constant 0 : i32
    %c0_i32_1 = arith.constant 0 : i32
    return %c0_i32, %c0_i32_0 : i32, i32
  }
  func.func @transform_7(%arg0: i32, %arg1: i32) -> (i32, i32) {
    %c0_i32 = arith.constant 0 : i32
    %c0_i32_0 = arith.constant 0 : i32
    %c0_i32_1 = arith.constant 0 : i32
    return %c0_i32, %c0_i32_0 : i32, i32
  }
  func.func @transform_8(%arg0: i32, %arg1: i32) -> (i32, i32, i32) {
    %c0_i32 = arith.constant 0 : i32
    %c0_i32_0 = arith.constant 0 : i32
    return %arg0, %arg1, %c0_i32 : i32, i32, i32
  }
}

</mosaic_0001>

<bundles_post_ra>
// kernel: tpu_custom_call.1
= control target key start
LH: loop header
LB: loop body
LE: loop exit
PB: predicated region body
PF: predicated region fallthrough
CT: control target
= control target key end

     0   :  { %s2279_s0 = inlined_call_operand.hbm [shape: f32[2,8,32], index: 0, kind: input, shape index: {}]   ;;  %s2280_s1 = inlined_call_operand.hbm [shape: f32[2,1,8], index: 1, kind: input, shape index: {}]   ;;  %s2281_s2 = inlined_call_operand.hbm [shape: f32[32,96], index: 2, kind: input, shape index: {}]   ;;  %s2282_s3 = inlined_call_operand.vmem [shape: f32[1,96], index: 3, kind: input, shape index: {}]   ;;  %s2283_s4 = inlined_call_operand.hbm [shape: f32[32,32], index: 4, kind: input, shape index: {}]   ;;  %s2284_s5 = inlined_call_operand.vmem [shape: f32[1,32], index: 5, kind: input, shape index: {}]   ;;  %s2285_s6 = inlined_call_operand.vmem [shape: f32[1,32], index: 6, kind: input, shape index: {}]   ;;  %s2286_s7 = inlined_call_operand.vmem [shape: f32[1,32], index: 7, kind: input, shape index: {}]   ;;  %s2287_s8 = inlined_call_operand.hbm [shape: f32[2,8,32], index: 8, kind: output, shape index: {}]  }
   0x1   :  { %2294 = sst [smem:[#allocation25_spill]] %s2279_s0 }
   0x2   :  { %2295 = sst [smem:[#allocation26_spill]] %s2281_s2 }
   0x3   :  { %2296 = sst [smem:[#allocation27_spill]] %s2283_s4 }
   0x4   :  { %13 = vsyncpa [#allocation7], 0 }
   0x5   :  { %15 = vsyncpa [#allocation7 + $0x1], 0 }
   0x6   :  { %16 = vsyncpa [#allocation10], 0 }
   0x7   :  { %18 = vsyncpa [#allocation10 + $0x1], 0 }
   0x8   :  { %19 = vsyncpa [#allocation13], 0 }
   0x9   :  { %20 = vsyncpa [#allocation8], 0 }
   0xa   :  { %22 = vsyncpa [#allocation8 + $0x1], 0  ;;  %s1979_s27 = smov 0   ;;  %s1981_s28 = smov 0  }
   0xb   :  { %s1983_s29 = smov 0   ;;  %s1985_s30 = smov 0  }
   0xc   :  { %s1987_s9 = smov 0   ;;  %s1989_s10 = smov 0  }
   0xd LB: > { %2297 = sst [smem:[#allocation20_spill]] %s1903_s29  ;;  %s2010_s11 = sadd.s32 4294967295, %s1915_s10   ;;  %s1915_s10 = sphi %s1989_s10, %s28_s10   ;;  %s1911_s9 = sphi %s1987_s9, %s2326_s9   ;;  %s1907_s30 = sphi %s1985_s30, %s2325_s30   ;;  %s1903_s29 = sphi %s1983_s29, %s2321_s29   ;;  %s1899_s28 = sphi %s1981_s28, %s2324_s28   ;;  %s1895_s27 = sphi %s1979_s27, %s2323_s27  }
   0xe   : > { %2298 = sst [smem:[#allocation21_spill]] %s1915_s10  ;;  %s1473_s12 = sadd.s32 4294967294, %s1915_s10  }
   0xf   : > { %p60_p0 = scmp.ne.s32.totalorder %s1899_s28, %s1895_s27  ;;  %p2288_p1 = scmp.eq.s32.totalorder %s2010_s11, 0 }
  0x10   : > { %p244_p3 = scmp.eq.s32.totalorder %s1473_s12, 1  ;;  %p1474_p5 = scmp.ge.s32.totalorder %s1915_s10, 1 }
  0x11   : > { %p2019_p4 = por %p2288_p1, %p60_p0  ;;  %p251_p7 = scmp.lt.s32.totalorder %s1915_s10, 3 }
  0x12   : > { %p2024_p6 = por %p244_p3, %p60_p0  ;;  %s1917_s16 = smov [#allocation11]  }
  0x13   : > { %p2029_p8 = pnand %p1474_p5, %p251_p7  ;;  %s263_s17 = sshll.u32 %s1917_s16, 4  ;;  %s264_s17 = int_to_ptr.vmem [resolvable:$true] %s263_s17 }
  0x14   : > { %s2300_s14 = scalar_select %p2024_p6, 1, 0 }
  0x15   : > { %p1611_p9 = pneg %p2029_p8  ;;  %s1918_s19 = smov [#allocation12]  }
  0x16   : > { %2301 = sst [smem:[#allocation22_spill]] %s2300_s14  ;;  %s279_s20 = sshll.u32 %s1918_s19, 4  ;;  %s280_s20 = int_to_ptr.vmem [resolvable:$true] %s279_s20 }
  0x17   : > { %p2038_p11 = pnand %p1611_p9, %p2288_p1  ;;  %s1726_s21 = scalar_lea.vmem %s264_s17, 512 }
  0x18   : > { %p1727_p13 = scmp.ne.s32.totalorder %s264_s17, %s1726_s21  ;;  %p1734_p5 = scmp.lt.s32.totalorder %s264_s17, %s264_s17 }
  0x19   : > { %p1717_p12 = pneg %p2038_p11  ;;  %p1735_p7 = scmp.lt.s32.totalorder %s1726_s21, %s1726_s21 }
  0x1b   : > { %p1729_p0 = pnand %p1727_p13, %p1717_p12  ;;  %p1736_p10 = por %p1735_p7, %p1734_p5 }
  0x1d   : > { %p1730_p3 = pneg %p1729_p0 }
  0x1f   : > { %p1737_p9 = pnand %p1736_p10, %p1730_p3 }
  0x21   : > { %1740 = shalt.err (!%p1737_p9)
}
  0x22   : > { %s1919_s22 = smov 128   ;;  %s1920_s23 = smov 8  }
  0x23   : > { %s2304_s2 = sld [smem:[#allocation26_spill]]  ;;  %s1752_s26 = scalar_lea.vmem %s280_s20, 512 }
  0x24   : > { %p1753_p1 = scmp.ne.s32.totalorder %s280_s20, %s1752_s26  ;;  %p1760_p2 = scmp.lt.s32.totalorder %s280_s20, %s280_s20 }
  0x25   : > { %p1761_p6 = scmp.lt.s32.totalorder %s1752_s26, %s1752_s26 }
  0x26   : > { %p1755_p13 = pnand %p1753_p1, %p1717_p12 }
  0x27   : > { %p1762_p5 = por %p1761_p6, %p1760_p2 }
  0x28   : > { %p1756_p0 = pneg %p1755_p13 }
  0x29   : > { %1614 = dma.hbm_to_vmem [thread:$0]  (!%p2038_p11), %s2304_s2, 512, %s264_s17, [#allocation10], %s1919_s22, %s1919_s22, %s1920_s23  }
  0x2a   : > { %p1763_p10 = pnand %p1762_p5, %p1756_p0 }
  0x2c   : > { %1766 = shalt.err (!%p1763_p10)
}
  0x2d   : > { %s2305_s4 = sld [smem:[#allocation27_spill]]  ;;  %s40_s17 = sadd.s32 1, %s1911_s9 }
  0x2e   : > { %s47_s19 = sadd.s32 1, %s1903_s29  ;;  %p42_p1 = scmp.ge.s32.totalorder %s40_s17, 2 }
  0x2f   : > { %p54_p2 = scmp.ne.s32.totalorder %s1903_s29, %s1899_s28  ;;  %p55_p6 = scmp.eq.s32.totalorder %s1915_s10, 0 }
  0x30   : > { %p1631_p12 = scmp.lt.s32.totalorder %s1915_s10, 2  ;;  %s2328_s17 = smov (%p42_p1, %s40_s17), 0 }
  0x31   : > { %2306 = sst [smem:[#allocation23_spill]] %s2328_s17  ;;  %p56_p3 = por %p55_p6, %p54_p2 }
  0x32   : > { %p2307_p7 = scmp.eq.s32.totalorder %s2010_s11, 1  ;;  %s44_s21 = ssub.s32 %s1911_s9, %s2328_s17 }
  0x33   : > { %1617 = dma.hbm_to_vmem [thread:$0]  (!%p2038_p11), %s2305_s4, 512, %s280_s20, [#allocation13], %s1919_s22, %s1919_s22, %s1920_s23  }
  0x34   : > { %p2070_p9 = por %p2307_p7, %p54_p2  ;;  %s2077_s24 = sand.u32 1, %s1903_s29  }
  0x35   : > { %p45_p11 = scmp.eq.s32.totalorder %s44_s21, 0  ;;  %s1478_s20 = sshll.u32 %s2077_s24, 3 }
  0x36   : > { %s1479_s22 = sshll.u32 %s1911_s9, 7  ;;  %s2310_s0 = sld [smem:[#allocation25_spill]] }
  0x37   : > { %s2082_s23 = scalar_select %p45_p11, %s1903_s29, %s47_s19  }
  0x38   : > { %s306_s16 = scalar_lea.vmem [#allocation6], %s1478_s20  ;;  %p2089_p13 = pnand %p1631_p12, %p56_p3 }
  0x39   : > { %2309 = sst [smem:[#allocation24_spill]] %s2082_s23  ;;  %s313_s2 = sshll.u32 %s306_s16, 4  ;;  %s314_s2 = int_to_ptr.vmem [resolvable:$true] %s313_s2 }
  0x3a   : > { %s320_s17 = sand.u32 1, %s1915_s10   ;;  %s303_s21 = scalar_lea.sflag [#allocation7], %s2077_s24 }
  0x3b   : > { %p1769_p0 = pneg %p2089_p13  ;;  %s1780_s19 = scalar_lea.vmem %s314_s2, 128 }
  0x3c   : > { %s311_s12 = scalar_lea.hbm %s2310_s0, %s1479_s22  ;;  %p1781_p5 = scmp.ne.s32.totalorder %s314_s2, %s1780_s19 }
  0x3d   : > { %s1921_s20 = smov [#allocation6]  }
  0x3e   : > { %p1783_p10 = pnand %p1781_p5, %p1769_p0  ;;  %s1785_s22 = sshll.u32 %s1921_s20, 4  ;;  %s1786_s22 = int_to_ptr.vmem [resolvable:$false] %s1785_s22 }
  0x3f   : > { %s1787_s25 = scalar_lea.vmem %s1786_s22, 256  ;;  %p1788_p2 = scmp.lt.s32.totalorder %s314_s2, %s1786_s22 }
  0x40   : > { %p1784_p1 = pneg %p1783_p10  ;;  %p1789_p6 = scmp.lt.s32.totalorder %s1787_s25, %s1780_s19 }
  0x42   : > { %p1790_p12 = por %p1789_p6, %p1788_p2 }
  0x44   : > { %p1791_p3 = pnand %p1790_p12, %p1784_p1 }
  0x46   : > { %1794 = shalt.err (!%p1791_p3)
}
  0x47   : > { %1621 = dma.hbm_to_vmem [thread:$0]  (!%p2089_p13), %s311_s12, 128, %s314_s2, %s303_s21  }
  0x48   : > { %s1480_s26 = sshll.u32 %s1911_s9, 4  ;;  %s323_s29 = scalar_lea.vmem [#allocation9], %s2077_s24 }
  0x49   : > { %s328_s23 = scalar_lea.hbm %s2280_s1, %s1480_s26  ;;  %s330_s20 = sshll.u32 %s323_s29, 4  ;;  %s331_s20 = int_to_ptr.vmem [resolvable:$true] %s330_s20 }
  0x4a   : > { %s321_s10 = scalar_lea.sflag [#allocation10], %s320_s17  ;;  %s1808_s22 = scalar_lea.vmem %s331_s20, 16 }
  0x4b   : > { %p1809_p7 = scmp.ne.s32.totalorder %s331_s20, %s1808_s22  ;;  %s1922_s19 = smov [#allocation9]  }
  0x4c   : > { %s1813_s25 = sshll.u32 %s1922_s19, 4  ;;  %s1814_s25 = int_to_ptr.vmem [resolvable:$false] %s1813_s25 }
  0x4d   : > { %p1811_p11 = pnand %p1809_p7, %p1769_p0  ;;  %s1815_s14 = scalar_lea.vmem %s1814_s25, 32 }
  0x4e   : > { %p1816_p10 = scmp.lt.s32.totalorder %s331_s20, %s1814_s25  ;;  %p1817_p1 = scmp.lt.s32.totalorder %s1815_s14, %s1808_s22 }
  0x4f   : > { %p1812_p5 = pneg %p1811_p11 }
  0x50   : > { %p1818_p2 = por %p1817_p1, %p1816_p10 }
  0x52   : > { %p1819_p6 = pnand %p1818_p2, %p1812_p5 }
  0x54   : > { %1822 = shalt.err (!%p1819_p6)
}
  0x55   : > { %1624 = dma.hbm_to_vmem [thread:$0]  (!%p2089_p13), %s328_s23, 16, %s331_s20, %s321_s10  }
  0x56   : > { %339 = sbr.rel (%p2029_p8) target bundleno = 1984 (0x7c0), region = 52  ;;  %s2115_s0 = sand.u32 (!%p2029_p8), 1, %s1899_s28  }
  0x57   : > { %s1482_s2 = sshll.u32 (!%p2029_p8), %s2115_s0, 3  ;;  %s342_s29 = scalar_lea.sflag (!%p2029_p8), [#allocation7], %s2115_s0 }
  0x58   : > { %s345_s14 = scalar_lea.vmem (!%p2029_p8), [#allocation6], %s1482_s2 }
  0x5b   : > { %1874 = dma.done.wait (%p2019_p4), %s342_s29, 128  }
  0x5c   : > { %1876 = vsyncadd (%p2019_p4), %s342_s29, 4294967168  ;;  %s350_s4 = sand.u32 1, %s2010_s11   ;;  %s353_s15 = scalar_lea.vmem [#allocation9], %s2115_s0 }
  0x5d   : > { %s351_s10 = scalar_lea.sflag [#allocation10], %s350_s4 }
  0x5e   : > { %1878 = dma.done.wait (%p2019_p4), %s351_s10, 16  }
  0x5f   : > { %1880 = vsyncadd (%p2019_p4), %s351_s10, 4294967280  ;;  %p2312_p8 = scmp.eq.s32.totalorder %s2010_s11, 0 }
  0x61   : > { %1882 = dma.done.wait (%p2312_p8), [#allocation10], 512   ;;  %p2313_p13 = pmov %p2312_p8 }
  0x62   : > { %p2314_p0 = pmov %p2312_p8 }
  0x63   : > { %1884 = vsyncadd (%p2313_p13), [#allocation10], 4294966784 }
  0x64   : > { %1886 = dma.done.wait (%p2314_p0), [#allocation13], 512   ;;  %p2315_p12 = pmov %p2314_p0 }
  0x65   : > { %v1923_v0 = vmov 0.0   ;;  %vm1924_vm0 = vmmov 0   ;;  %v406_v1 = vld [vmem:[#allocation11 + $0x18] sm:$0xff]  ;;  %v405_v2 = vld [vmem:[#allocation11 + $0x10] sm:$0xff]  ;;  %v404_v3 = vld [vmem:[#allocation11 + $0x8] sm:$0xff]  ;;  %vm414_vm1 = vcmask 261120  }
  0x66   : > { %1888 = vsyncadd (%p2315_p12), [#allocation13], 4294966784  ;;  %1535 = vmatprep.subr.mxu0 %v1923_v0  ;;  %1543 = vmatprep.mubr.msk.f32.mxu0 %vm1924_vm0, %v1923_v0  ;;  %v403_v4 = vld [vmem:[#allocation11] sm:$0xff]  ;;  %v2147_v5 = vld [vmem:[%s345_s14] sm:$0xff]  ;;  %s1925_s17 = smov 64   ;;  %s1926_s24 = smov 96  }
  0x67   : > { %1546 = vmatprep.subr.mxu1 %v1923_v0  ;;  %1548 = vmatprep.mubr.msk.f32.mxu1 %vm1924_vm0, %v1923_v0  ;;  %v1486_v6 = vld [vmem:[%s2282_s3] ss:$0 sm:$0xff]  ;;  %vm512_vm2 = vcmask 64512   ;;  %s1927_s23 = smov 120   ;;  %s1928_s12 = smov 112   ;;  %vm855_vm3 = vcmask 130112  }
  0x68   : > { %1536 = vmatpush3.msra.mxu0 %v406_v1  ;;  %s1929_s21 = smov 104   ;;  %v1488_v21 = vld [vmem:[%s353_s15] ss:$0 sm:$0xff]  ;;  %s1930_s26 = smov 8   ;;  %vm1035_vm4 = vcmask 195712   ;;  %vm1215_vm5 = vcmask 261312  }
  0x69   : > { %1537 = vmatprep.subr.mxu0 %v1923_v0  ;;  %s1931_s16 = smov 16   ;;  %s1932_s20 = smov 24  }
  0x6a   : > { %1538 = vmatpush3.msra.mxu0 %v405_v2  ;;  %s1506_s10 = sshll.u32 %s1907_s30, 7  ;;  %s397_s15 = scalar_lea.vmem [#allocation14], %s1482_s2 }
  0x6b   : > { %1539 = vmatprep.subr.mxu0 %v1923_v0  ;;  %s1350_s11 = sshll.u32 %s397_s15, 4  ;;  %s1351_s11 = int_to_ptr.vmem [resolvable:$true] %s1350_s11 }
  0x6c   : > { %1540 = vmatpush3.msra.mxu0 %v404_v3 }
  0x6d   : > { %1541 = vmatprep.subr.mxu0 %v1923_v0 }
  0x6e   : > { %1542 = vmatpush3.msra.mxu0 %v403_v4 }
  0x6f   : > { %1544 = vmatmul.mubr.msk.f32.vlgmr.msra.gmra.mxu0 %vm414_vm1, %v2147_v5  ;;  %1566 = vmatprep.subr.mxu0 %v1923_v0 }
  0x70   : > { %1568 = vmatprep.mubr.msk.f32.mxu0 %vm1924_vm0, %v1923_v0 }
 0x12f   : > { %v484_v7 = vpop.f32.mrf.mxu0 }
 0x130   : > { %v485_v8 = vadd.f32 %v1486_v6, %v484_v7 }
 0x131   : > { %v1545_v9 = vpop.f32.mrf.mxu0 }
 0x132   : > { %488 = vst.msk [vmem:[#allocation2] sm:$0xff] %vm414_vm1, %v485_v8  ;;  %494 = vrot.lane.b32.xlu1 %v485_v8, %s1925_s17  ;;  %490 = vrot.lane.b32.xlu0 %v485_v8, %s1926_s24  ;;  %s1348_s24 = scalar_lea.hbm %s2287_s8, %s1506_s10 }
 0x139   : > { %v509_v13 = vld [vmem:[#allocation2] sm:$0xff] }
 0x1a4   : > { %v495_v10 = vpop.permute.xlu1 %494  ;;  %v491_v11 = vpop.permute.xlu0 %490 }
 0x1a5   : > { %497 = vst.msk [vmem:[#allocation4] sm:$0xff] %vm414_vm1, %v495_v10  ;;  %493 = vst.msk [vmem:[#allocation3] sm:$0xff] %vm414_vm1, %v491_v11 }
 0x1ac   : > { %v678_v12 = vld [vmem:[#allocation3] sm:$0xff]  ;;  %v2165_v14 = vld [vmem:[#allocation4] sm:$0xff] }
 0x1ad   : > { %684 = vrot.lane.b32.xlu1 %v678_v12, %s1927_s23  ;;  %1547 = vmatpush3.xpose.msk.msra.mxu1 %vm512_vm2, %v678_v12 }
 0x1ae   : > { %1551 = vmatprep.subr.mxu1 %v1923_v0 }
 0x1b0   : > { %1549 = vmatmul.mubr.msk.f32.vlgmr.msra.gmra.mxu1 %vm512_vm2, %v509_v13 }
 0x1b1   : > { %681 = vrot.lane.b32.xlu1 %v509_v13, %s1927_s23  ;;  %1552 = vmatpush3.msra.mxu1 %v2165_v14 }
 0x1b2   : > { %1553 = vmatprep.mubr.msk.f32.mxu1 %vm1924_vm0, %v1923_v0  ;;  %1556 = vmatprep.subr.mxu1 %v1923_v0 }
 0x1b5   : > { %864 = vrot.lane.b32.xlu1 %v678_v12, %s1928_s12 }
 0x1b9   : > { %861 = vrot.lane.b32.xlu1 %v509_v13, %s1928_s12 }
 0x1bd   : > { %1044 = vrot.lane.b32.xlu1 %v678_v12, %s1929_s21 }
 0x1c1   : > { %1041 = vrot.lane.b32.xlu1 %v509_v13, %s1929_s21 }
 0x21f   : > { %v685_v15 = vpop.permute.xlu1 %684 }
 0x223   : > { %v682_v16 = vpop.permute.xlu1 %681 }
 0x227   : > { %v865_v17 = vpop.permute.xlu1 %864 }
 0x228   : > { %1567 = vmatpush3.xpose.msk.msra.mxu0 %vm512_vm2, %v865_v17  ;;  %v1220_v17 = vld [vmem:[#allocation12 + $0x10] sm:$0xff] }
 0x229   : > { %1576 = vmatprep.subr.mxu0 %v1923_v0 }
 0x22b   : > { %v862_v18 = vpop.permute.xlu1 %861 }
 0x22c   : > { %1569 = vmatmul.mubr.msk.f32.vlgmr.msra.gmra.mxu0 %vm512_vm2, %v862_v18 }
 0x22d   : > { %1578 = vmatprep.mubr.msk.f32.mxu0 %vm1924_vm0, %v1923_v0 }
 0x22f   : > { %v1045_v19 = vpop.permute.xlu1 %1044 }
 0x230   : > { %1577 = vmatpush3.xpose.msk.msra.mxu0 %vm512_vm2, %v1045_v19 }
 0x231   : > { %1586 = vmatprep.subr.mxu0 %v1923_v0 }
 0x233   : > { %v1042_v20 = vpop.permute.xlu1 %1041 }
 0x234   : > { %1579 = vmatmul.mubr.msk.f32.vlgmr.msra.gmra.mxu0 %vm512_vm2, %v1042_v20 }
 0x235   : > { %1594 = vmatprep.mubr.msk.f32.mxu0 %vm1924_vm0, %v1923_v0 }
 0x270   : > { %v585_v22 = vpop.f32.mrf.mxu1 }
 0x271   : > { %v586_v23 = vadd.f32 %v1488_v21, %v585_v22  ;;  %v1219_v22 = vld [vmem:[#allocation12 + $0x8] sm:$0xff] }
 0x272   : > { %v1550_v24 = vpop.f32.mrf.mxu1 }
 0x273   : > { %v589_v25 = vsel %vm512_vm2, %v586_v23, -inf }
 0x274   : > { %590 = vmax.xlane.f32.xlu0 %v589_v25  ;;  %v1218_v25 = vld [vmem:[#allocation12] sm:$0xff] }
 0x28a   : > { %774 = vrot.lane.b32.xlu0 %v2165_v14, %s1927_s23  ;;  %s1336_s23 = scalar_lea.sflag [#allocation8], %s2115_s0 }
 0x2ec   : > { %v936_v26 = vpop.f32.mrf.mxu0 }
 0x2ed   : > { %v937_v27 = vadd.f32 %v1488_v21, %v936_v26 }
 0x2ee   : > { %v1570_v28 = vpop.f32.mrf.mxu0 }
 0x2ef   : > { %v940_v29 = vsel %vm512_vm2, %v937_v27, -inf }
 0x2f0   : > { %941 = vmax.xlane.f32.xlu0 %v940_v29 }
 0x2f4   : > { %v1116_v30 = vpop.f32.mrf.mxu0 }
 0x2f5   : > { %v1117_v31 = vadd.f32 %v1488_v21, %v1116_v30 }
 0x2f6   : > { %v1580_v32 = vpop.f32.mrf.mxu0 }
 0x2f7   : > { %v1120_v33 = vsel %vm512_vm2, %v1117_v31, -inf }
 0x2f8   : > { %1121 = vmax.xlane.f32.xlu0 %v1120_v33 }
 0x2fd   : > { %v591_v34 = vpop.xlane.xlu0 %590 }
 0x2fe   : > { %v592_v35 = vsub.f32 %v586_v23, %v591_v34 }
 0x300   : > { %v593_v36 = vmul.f32 1.442695, %v592_v35 }
 0x301   : > { %v775_v38 = vpop.permute.xlu0 %774 }
 0x302   : > { %1697 = vpow2.f32 %v593_v36 }
 0x30e   : > { %1134 = vrot.lane.b32.xlu0 %v2165_v14, %s1929_s21  ;;  %s1933_s21 = smov [#allocation14]  }
 0x30f   : > { %v1698_v37 = vpop.eup %1697  ;;  %s1827_s30 = sshll.u32 %s1933_s21, 4  ;;  %s1828_s30 = int_to_ptr.vmem [resolvable:$false] %s1827_s30 }
 0x310   : > { %1554 = vmatmul.mubr.msk.f32.vlgmr.msra.gmra.mxu1 %vm512_vm2, %v1698_v37  ;;  %v595_v62 = vsel %vm512_vm2, %v1698_v37, 0.0  ;;  %s1829_s2 = scalar_lea.vmem %s1828_s30, 256  ;;  %p1830_p11 = scmp.lt.s32.totalorder %s1351_s11, %s1828_s30 }
 0x311   : > { %1557 = vmatpush3.xpose.msk.msra.mxu1 %vm512_vm2, %v685_v15  ;;  %1558 = vmatprep.mubr.msk.f32.mxu1 %vm1924_vm0, %v1923_v0 }
 0x312   : > { %1561 = vmatprep.subr.mxu1 %v1923_v0 }
 0x314   : > { %1559 = vmatmul.mubr.msk.f32.vlgmr.msra.gmra.mxu1 %vm512_vm2, %v682_v16  ;;  %v1221_v16 = vld [vmem:[#allocation12 + $0x18] sm:$0xff] }
 0x315   : > { %1562 = vmatpush3.msra.mxu1 %v775_v38  ;;  %1563 = vmatprep.mubr.msk.f32.mxu1 %vm1924_vm0, %v1923_v0  ;;  %v1501_v38 = vld [vmem:[%s2284_s5] ss:$0 sm:$0xff] }
 0x316   : > { %1571 = vmatprep.subr.mxu1 %v1923_v0  ;;  %1587 = vmatpush3.msra.mxu0 %v1221_v16 }
 0x317   : > { %1588 = vmatprep.subr.mxu0 %v1923_v0 }
 0x318   : > { %1589 = vmatpush3.msra.mxu0 %v1220_v17 }
 0x319   : > { %1590 = vmatprep.subr.mxu0 %v1923_v0 }
 0x31a   : > { %1591 = vmatpush3.msra.mxu0 %v1219_v22 }
 0x31b   : > { %1592 = vmatprep.subr.mxu0 %v1923_v0 }
 0x31c   : > { %1593 = vmatpush3.msra.mxu0 %v1218_v25 }
 0x379   : > { %v942_v45 = vpop.xlane.xlu0 %941 }
 0x37a   : > { %v943_v46 = vsub.f32 %v937_v27, %v942_v45 }
 0x37c   : > { %v944_v47 = vmul.f32 1.442695, %v943_v46 }
 0x37e   : > { %1699 = vpow2.f32 %v944_v47 }
 0x381   : > { %v1122_v50 = vpop.xlane.xlu0 %1121 }
 0x382   : > { %v1123_v51 = vsub.f32 %v1117_v31, %v1122_v50 }
 0x384   : > { %v1124_v54 = vmul.f32 1.442695, %v1123_v51 }
 0x385   : > { %v1135_v60 = vpop.permute.xlu0 %1134 }
 0x38b   : > { %v1700_v48 = vpop.eup %1699 }
 0x38c   : > { %v946_v49 = vsel %vm512_vm2, %v1700_v48, 0.0 }
 0x3d0   : > { %v671_v39 = vpop.f32.mrf.mxu1 }
 0x3d2   : > { %v1555_v40 = vpop.f32.mrf.mxu1 }
 0x3d4   : > { %v756_v41 = vpop.f32.mrf.mxu1 }
 0x3d5   : > { %v757_v42 = vadd.f32 %v1488_v21, %v756_v41 }
 0x3d6   : > { %v1560_v43 = vpop.f32.mrf.mxu1 }
 0x3d7   : > { %v760_v44 = vsel %vm512_vm2, %v757_v42, -inf }
 0x3d8   : > { %761 = vmax.xlane.f32.xlu1 %v760_v44 }
 0x3e9   : > { %954 = vrot.lane.b32.xlu1 %v2165_v14, %s1928_s12  ;;  %s1823_s12 = scalar_lea.vmem %s1351_s11, 128 }
 0x3ea   : > { %p1824_p4 = scmp.ne.s32.totalorder %s1351_s11, %s1823_s12  ;;  %p1831_p5 = scmp.lt.s32.totalorder %s1829_s2, %s1823_s12 }
 0x3ec   : > { %p1825_p3 = pnand %p1824_p4, %p2070_p9  ;;  %p1832_p10 = por %p1831_p5, %p1830_p11 }
 0x3ee   : > { %p1826_p7 = pneg %p1825_p3 }
 0x3f0   : > { %p1833_p1 = pnand %p1832_p10, %p1826_p7 }
 0x40d   : > { %947 = vadd.xlane.f32.xlu1 %v946_v49 }
 0x461   : > { %v762_v52 = vpop.xlane.xlu1 %761 }
 0x462   : > { %v763_v53 = vsub.f32 %v757_v42, %v762_v52 }
 0x464   : > { %v764_v55 = vmul.f32 1.442695, %v763_v53 }
 0x465   : > { %v955_v57 = vpop.permute.xlu1 %954 }
 0x466   : > { %1701 = vpow2.f32 %v764_v55 }
 0x467   : > { %1703 = vpow2.f32 %v1124_v54  ;;  %v1504_v54 = vld [vmem:[%s2286_s7] ss:$0 sm:$0xff] }
 0x473   : > { %v1702_v56 = vpop.eup %1701 }
 0x474   : > { %1564 = vmatmul.mubr.msk.f32.vlgmr.msra.gmra.mxu1 %vm512_vm2, %v1702_v56  ;;  %v766_v58 = vsel %vm512_vm2, %v1702_v56, 0.0  ;;  %v1704_v59 = vpop.eup %1703 }
 0x475   : > { %1572 = vmatpush3.msra.mxu1 %v955_v57  ;;  %767 = vadd.xlane.f32.xlu0 %v766_v58  ;;  %v1126_v61 = vsel %vm512_vm2, %v1704_v59, 0.0 }
 0x476   : > { %1573 = vmatprep.mubr.msk.f32.mxu1 %vm1924_vm0, %v1923_v0  ;;  %1581 = vmatprep.subr.mxu1 %v1923_v0 }
 0x478   : > { %1574 = vmatmul.mubr.msk.f32.vlgmr.msra.gmra.mxu1 %vm512_vm2, %v1700_v48 }
 0x479   : > { %1582 = vmatpush3.msra.mxu1 %v1135_v60  ;;  %1127 = vadd.xlane.f32.xlu0 %v1126_v61 }
 0x47a   : > { %1583 = vmatprep.mubr.msk.f32.mxu1 %vm1924_vm0, %v1923_v0 }
 0x47c   : > { %1584 = vmatmul.mubr.msk.f32.vlgmr.msra.gmra.mxu1 %vm512_vm2, %v1704_v59 }
 0x47d   : > { %596 = vadd.xlane.f32.xlu0 %v595_v62 }
 0x496   : > { %v948_v9 = vpop.xlane.xlu1 %947 }
 0x4fe   : > { %v768_v63 = vpop.xlane.xlu0 %767 }
 0x502   : > { %v1128_v1 = vpop.xlane.xlu0 %1127 }
 0x506   : > { %v597_v2 = vpop.xlane.xlu0 %596 }
 0x507   : > { %1705 = vrcp.f32 %v597_v2 }
 0x508   : > { %1707 = vrcp.f32 %v768_v63 }
 0x509   : > { %1709 = vrcp.f32 %v948_v9 }
 0x50a   : > { %1711 = vrcp.f32 %v1128_v1 }
 0x514   : > { %v1706_v3 = vpop.eup %1705 }
 0x515   : > { %v599_v4 = vmul.f32 %v1706_v3, %v597_v2  ;;  %v1708_v10 = vpop.eup %1707 }
 0x516   : > { %v770_v11 = vmul.f32 %v1708_v10, %v768_v63  ;;  %v1710_v12 = vpop.eup %1709 }
 0x517   : > { %v600_v6 = vsub.f32 2.0, %v599_v4  ;;  %v950_v13 = vmul.f32 %v1710_v12, %v948_v9  ;;  %v1712_v15 = vpop.eup %1711 }
 0x518   : > { %v771_v14 = vsub.f32 2.0, %v770_v11  ;;  %v1130_v19 = vmul.f32 %v1712_v15, %v1128_v1 }
 0x519   : > { %v601_v7 = vmul.f32 %v1706_v3, %v600_v6  ;;  %v951_v18 = vsub.f32 2.0, %v950_v13 }
 0x51a   : > { %v772_v20 = vmul.f32 %v1708_v10, %v771_v14  ;;  %v1131_v26 = vsub.f32 2.0, %v1130_v19 }
 0x51b   : > { %v675_v8 = vmul.f32 %v671_v39, %v601_v7  ;;  %v952_v27 = vmul.f32 %v1710_v12, %v951_v18 }
 0x51c   : > { %v1132_v31 = vmul.f32 %v1712_v15, %v1131_v26 }
 0x51d   : > { %676 = vst.msk [vmem:[#allocation5] sm:$0xff] %vm512_vm2, %v675_v8 }
 0x534   : > { %v846_v21 = vpop.f32.mrf.mxu1 }
 0x535   : > { %v850_v23 = vmul.f32 %v846_v21, %v772_v20 }
 0x536   : > { %v1565_v24 = vpop.f32.mrf.mxu1 }
 0x537   : > { %852 = vrot.lane.b32.xlu0 %v850_v23, %s1930_s26 }
 0x538   : > { %v1026_v28 = vpop.f32.mrf.mxu1 }
 0x539   : > { %v1030_v29 = vmul.f32 %v1026_v28, %v952_v27 }
 0x53a   : > { %v1575_v30 = vpop.f32.mrf.mxu1 }
 0x53b   : > { %1032 = vrot.lane.b32.xlu1 %v1030_v29, %s1931_s16 }
 0x53c   : > { %v1206_v32 = vpop.f32.mrf.mxu1 }
 0x53d   : > { %v1210_v33 = vmul.f32 %v1206_v32, %v1132_v31 }
 0x53e   : > { %v1585_v34 = vpop.f32.mrf.mxu1 }
 0x53f   : > { %1212 = vrot.lane.b32.xlu0 %v1210_v33, %s1932_s20 }
 0x5a9   : > { %v853_v35 = vpop.permute.xlu0 %852 }
 0x5aa   : > { %856 = vst.msk [vmem:[#allocation5] sm:$0xff] %vm855_vm3, %v853_v35 }
 0x5ad   : > { %v1033_v36 = vpop.permute.xlu1 %1032 }
 0x5ae   : > { %1036 = vst.msk [vmem:[#allocation5] sm:$0xff] %vm1035_vm4, %v1033_v36 }
 0x5b1   : > { %v1213_v37 = vpop.permute.xlu0 %1212 }
 0x5b2   : > { %1216 = vst.msk [vmem:[#allocation5] sm:$0xff] %vm1215_vm5, %v1213_v37 }
 0x5b9   : > { %v1217_v0 = vld [vmem:[#allocation5] sm:$0xff] }
 0x5ba   : > { %1595 = vmatmul.mubr.msk.f32.vlgmr.msra.gmra.mxu0 %vm414_vm1, %v1217_v0 }
 0x67a   : > { %v1299_v39 = vpop.f32.mrf.mxu0 }
 0x67b   : > { %v1300_v40 = vadd.f32 %v1501_v38, %v1299_v39 }
 0x67c   : > { %v1596_v41 = vpop.f32.mrf.mxu0 }
 0x67d   : > { %v1303_v42 = vadd.f32 %v1300_v40, %v2147_v5  ;;  %v1503_v5 = vld [vmem:[%s2285_s6] ss:$0 sm:$0xff] }
 0x67f   : > { %v1304_v43 = vsel %vm414_vm1, %v1303_v42, 0.0 }
 0x680   : > { %1305 = vadd.xlane.f32.xlu0 %v1304_v43 }
 0x709   : > { %v1306_v44 = vpop.xlane.xlu0 %1305 }
 0x70a   : > { %v1308_v45 = vmul.f32 0.03125, %v1306_v44 }
 0x70c   : > { %v1309_v46 = vsub.f32 %v1303_v42, %v1308_v45 }
 0x70e   : > { %v1310_v47 = vmul.f32 %v1309_v46, %v1309_v46 }
 0x710   : > { %v1311_v48 = vsel %vm414_vm1, %v1310_v47, 0.0 }
 0x711   : > { %1312 = vadd.xlane.f32.xlu1 %v1311_v48 }
 0x79a   : > { %v1313_v49 = vpop.xlane.xlu1 %1312 }
 0x79b   : > { %v1314_v50 = vmul.f32 0.03125, %v1313_v49 }
 0x79d   : > { %v1315_v51 = vadd.f32 1e-12, %v1314_v50 }
 0x79f   : > { %1713 = vrsqrt.f32 %v1315_v51 }
 0x7ac   : > { %v1714_v52 = vpop.eup %1713 }
 0x7ad   : > { %v1317_v53 = vmul.f32 %v1714_v52, %v1309_v46 }
 0x7af   : > { %v1325_v55 = vmul.f32 %v1503_v5, %v1317_v53 }
 0x7b1   : > { %v1333_v56 = vadd.f32 %v1504_v54, %v1325_v55 }
 0x7b3   : > { %1334 = vst.msk [vmem:[%s397_s15] sm:$0xff] %vm414_vm1, %v1333_v56 }
 0x7b4   : > { %1836 = shalt.err (!%p1833_p1)
}
 0x7b5   : > { %s1837_s26 = scalar_lea.hbm %s1348_s24, 128  ;;  %s1841_s20 = scalar_lea.hbm %s2287_s8, 256 }
 0x7b6   : > { %p1838_p2 = scmp.ne.s32.totalorder %s1348_s24, %s1837_s26  ;;  %p1842_p13 = scmp.lt.s32.totalorder %s1348_s24, %s2287_s8 }
 0x7b7   : > { %p1843_p0 = scmp.lt.s32.totalorder %s1841_s20, %s1837_s26 }
 0x7b8   : > { %p1839_p6 = pnand %p1838_p2, %p2070_p9 }
 0x7b9   : > { %p1844_p12 = por %p1843_p0, %p1842_p13 }
 0x7ba   : > { %p1840_p8 = pneg %p1839_p6 }
 0x7bc   : > { %p1845_p4 = pnand %p1844_p12, %p1840_p8 }
 0x7be   : > { %1848 = shalt.err (!%p1845_p4)
}
 0x7bf   : > { %1609 = dma.vmem_to_hbm [thread:$0]  (%p2070_p9), %s1351_s11, 128, %s1348_s24, %s1336_s23  }
 0x7c0 PF: > { %s2316_s25 = sld [smem:[#allocation22_spill]]  ;;  %s1362_s14 = sand.u32 1, %s1895_s27  }
 0x7c1   : > { %s2317_s29 = sld [smem:[#allocation21_spill]]  ;;  %s1363_s4 = scalar_lea.sflag [#allocation8], %s1362_s14 }
 0x7c6   : > { %p2318_p3 = scmp.ne.s32.totalorder %s2316_s25, 0 }
 0x7c7   : > { %p2319_p7 = scmp.ge.s32.totalorder %s2317_s29, 2 }
 0x7c9   : > { %p1626_p11 = pnand %p2319_p7, %p2318_p3 }
 0x7cb   : > { %p1627_p5 = pneg %p1626_p11 }
 0x7cd   : > { %1890 = dma.done.wait (%p1627_p5), %s1363_s4, 128  }
 0x7ce   : > { %1892 = vsyncadd (%p1627_p5), %s1363_s4, 4294967168  ;;  %s28_s10 = sadd.s32 1, %s2317_s29   ;;  %s2320_s15 = sld [smem:[#allocation20_spill]] }
 0x7cf   : > { %p25_p10 = scmp.ge.s32.totalorder %s28_s10, 4   ;;  %s2321_s29 = sld [smem:[#allocation24_spill]] }
 0x7d0   : > { %s2322_s18 = sld [smem:[#allocation23_spill]]  ;;  %s2323_s27 = smov %s1899_s28 }
 0x7d1   : > { %s2325_s30 = smov %s1911_s9 }
 0x7d2   :  { %27 = sbr.rel (!%p25_p10) target bundleno = 13 (0xd), region = 124 }
 0x7d4   : > { %s2324_s28 = smov %s2320_s15 }
 0x7d6   : > { %s2326_s9 = smov %s2322_s18 }
 0x7d7   :  { %1368 = vsyncpa [#allocation7], 1 }
 0x7d8   :  { %1370 = vsyncpa [#allocation7 + $0x1], 1 }
 0x7d9   :  { %1371 = vsyncpa [#allocation10], 1 }
 0x7da   :  { %1373 = vsyncpa [#allocation10 + $0x1], 1 }
 0x7db   :  { %1374 = vsyncpa [#allocation13], 1 }
 0x7dc   :  { %1375 = vsyncpa [#allocation8], 1 }
 0x7dd   :  { %1377 = vsyncpa [#allocation8 + $0x1], 1 }

</bundles_post_ra>
